<compile_context>
chip_gen: v7x
topology: tpu7x:2x2x1
jax: 0.10.0
libtpu: 0.0.40
codegen_flags: <defaults>
</compile_context>

<pallas_src>
import functools

import numpy as np
import jax
import jax.numpy as jnp
from jax.experimental import pallas as pl
from jax.experimental.pallas import tpu as pltpu


LANE = 128      # TPU lane width -> per-gate padded block (and padded vocab block)
SUBLANE = 8     # f32 sublane tile


def _round_up(x, m):
    return (x + m - 1) // m * m


def encoder_gru_kernel(tok_ref, tbl_ref, whh_ref, bgi_ref, bhn_ref, h0_ref,
                       out_ref, hfin_ref):
    """Fused Embedding + GRU forward. All refs are whole arrays resident in VMEM.

    tok_ref : (S*Bp, 1)   int32  token ids, seq-major, batch padded to Bp (pad token = 0)
    tbl_ref : (Vp, 3*Hp)  bf16   fused (Embedding @ W_ih^T) table, per-gate 128-lane blocks,
                                 vocab padded to Vp (row 0 = padding_idx -> all zeros)
    whh_ref : (Hp, 3*Hp)  bf16   W_hh^T, same per-gate layout
    bgi_ref : (1, 3*Hp)   f32    b_ih with the r/z parts of b_hh folded in (n block = b_in)
    bhn_ref : (1, Hp)     f32    b_hn (lives inside the r * (...) term)
    h0_ref  : (Bp, Hp)    f32    initial hidden state
    out_ref : (S, Bp, Hp) f32    all GRU hidden states (seq-major)
    hfin_ref: (Bp, Hp)    f32    final hidden state
    """
    S, Bp, Hp = out_ref.shape
    Vp = tbl_ref.shape[0]
    SB = S * Bp

    # --- Embedding lookup + input projection in ONE MXU matmul via the fused table. ---
    tok = tok_ref[...]                                              # (SB, 1) i32
    iota = jax.lax.broadcasted_iota(jnp.int32, (SB, Vp), 1)
    onehot = (iota == tok).astype(jnp.bfloat16)                     # bool -> bf16, one pass
    gi_all = jnp.dot(onehot, tbl_ref[...],
                     preferred_element_type=jnp.float32) + bgi_ref[...]   # (SB, 3*Hp) f32

    # --- Hoist loop invariants: recurrent weights and the b_hn broadcast. ---
    whh = whh_ref[...]                                              # (Hp, 3*Hp) bf16
    bhn = jnp.broadcast_to(bhn_ref[...], (Bp, Hp))                  # (Bp, Hp)  f32

    # --- Serial recurrence: one MXU matmul per step; gate math stays f32 (v5e-safe). ---
    h = h0_ref[...]                                                 # (Bp, Hp) f32
    for t in range(S):                                              # S is small & static
        gi = gi_all[t * Bp:(t + 1) * Bp, :]                         # static, sublane-aligned
        gh = jnp.dot(h.astype(jnp.bfloat16), whh,
                     preferred_element_type=jnp.float32)            # (Bp, 3*Hp)
        r = jax.nn.sigmoid(gi[:, 0 * Hp:1 * Hp] + gh[:, 0 * Hp:1 * Hp])
        z = jax.nn.sigmoid(gi[:, 1 * Hp:2 * Hp] + gh[:, 1 * Hp:2 * Hp])
        n = jnp.tanh(gi[:, 2 * Hp:3 * Hp] + r * (gh[:, 2 * Hp:3 * Hp] + bhn))
        h = (1.0 - z) * n + z * h
        out_ref[t] = h                                              # lane-dense (Bp, Hp) store
    hfin_ref[...] = h


@functools.partial(jax.jit, static_argnames=("hidden_size",))
def encoder_rnn_forward(tokens, hidden, params, *, hidden_size):
    """tokens: (B, S) int; hidden: (1, B, H) f32. Returns (output (B,S,H), hidden (1,B,H))."""
    B, S = tokens.shape
    H = hidden_size
    Hp = params["w_hh_pad"].shape[0]
    Bp = _round_up(max(B, 1), SUBLANE)

    # Tiny glue: pad batch to the 8-sublane tile and flatten tokens seq-major.
    tok = jnp.pad(tokens.astype(jnp.int32), ((0, Bp - B), (0, 0)))  # pad rows -> token 0
    tok = tok.T.reshape(S * Bp, 1)
    h0 = jnp.pad(hidden[0].astype(jnp.float32), ((0, Bp - B), (0, Hp - H)))

    vmem = pl.BlockSpec(memory_space=pltpu.MemorySpace.VMEM)
    out_seq, h_fin = pl.pallas_call(
        encoder_gru_kernel,
        out_shape=(jax.ShapeDtypeStruct((S, Bp, Hp), jnp.float32),
                   jax.ShapeDtypeStruct((Bp, Hp), jnp.float32)),
        in_specs=[vmem] * 6,
        out_specs=(vmem, vmem),
    )(tok, params["tbl_pad"], params["w_hh_pad"], params["b_gi_pad"],
      params["b_hn_pad"], h0)

    output = jnp.transpose(out_seq[:, :B, :H], (1, 0, 2))   # (B, S, H), batch_first
    hidden_out = h_fin[:B, :H][None]                        # (1, B, H)
    return output, hidden_out


def init_params(key, input_size, hidden_size):
    """Mirrors PyTorch init: Embedding ~ N(0,1) with padding_idx=0 zeroed; GRU params
    ~ U(-1/sqrt(H), 1/sqrt(H)). Returns (kernel_params, ref_params)."""
    V, H = input_size, hidden_size
    Hp = _round_up(H, LANE)
    Vp = _round_up(V, LANE)
    ks = jax.random.split(key, 5)
    bound = 1.0 / np.sqrt(H)
    u = lambda k, shape: jax.random.uniform(k, shape, jnp.float32, -bound, bound)

    emb = jax.random.normal(ks[0], (V, H), jnp.float32).at[0].set(0.0)   # padding_idx=0
    w_ih = u(ks[1], (3 * H, H))          # PyTorch gate order: r, z, n
    w_hh = u(ks[2], (3 * H, H))
    b_ih = u(ks[3], (3 * H,))
    b_hh = u(ks[4], (3 * H,))

    # Fold the embedding into W_ih offline (exact in f32, then a single bf16 quantization):
    #   gi = E[token] @ W_ih^T + b  ==  (E @ W_ih^T)[token] + b
    fused = emb @ w_ih.T                                              # (V, 3H) f32

    tbl_pad = jnp.zeros((Vp, 3 * Hp), jnp.float32)
    w_hh_pad = jnp.zeros((Hp, 3 * Hp), jnp.float32)
    b_gi = jnp.zeros((1, 3 * Hp), jnp.float32)
    for g in range(3):
        tbl_pad = tbl_pad.at[:V, g * Hp:g * Hp + H].set(fused[:, g * H:(g + 1) * H])
        w_hh_pad = w_hh_pad.at[:H, g * Hp:g * Hp + H].set(w_hh[g * H:(g + 1) * H, :].T)
        bias = b_ih[g * H:(g + 1) * H]
        if g < 2:                         # b_hh for r, z folds linearly into gi
            bias = bias + b_hh[g * H:(g + 1) * H]
        b_gi = b_gi.at[0, g * Hp:g * Hp + H].set(bias)
    b_hn = jnp.zeros((1, Hp), jnp.float32).at[0, :H].set(b_hh[2 * H:3 * H])

    kernel_params = {
        "tbl_pad": tbl_pad.astype(jnp.bfloat16),      # bf16 feeds the MXU
        "w_hh_pad": w_hh_pad.astype(jnp.bfloat16),
        "b_gi_pad": b_gi,                             # biases stay f32
        "b_hn_pad": b_hn,
    }
    ref_params = {                                     # full-precision f32 reference params
        "emb": emb,
        "w_ih_t": w_ih.T,
        "w_hh_t": w_hh.T,
        "b_ih": b_ih.reshape(1, 3 * H),
        "b_hh": b_hh.reshape(1, 3 * H),
    }
    return kernel_params, ref_params


def reference_forward(tokens, hidden, ref, *, hidden_size):
    """Pure-JAX f32 reference replicating PyTorch EncoderRNN semantics (batch_first)."""
    H = hidden_size
    emb = jnp.take(ref["emb"], tokens, axis=0)           # (B, S, H)
    h = hidden[0].astype(jnp.float32)
    outs = []
    for t in range(emb.shape[1]):
        gi = emb[:, t, :] @ ref["w_ih_t"] + ref["b_ih"]
        gh = h @ ref["w_hh_t"] + ref["b_hh"]
        r = jax.nn.sigmoid(gi[:, :H] + gh[:, :H])
        z = jax.nn.sigmoid(gi[:, H:2 * H] + gh[:, H:2 * H])
        n = jnp.tanh(gi[:, 2 * H:] + r * gh[:, 2 * H:])
        h = (1.0 - z) * n + z * h
        outs.append(h)
    return jnp.stack(outs, axis=1), h[None]


if __name__ == "__main__":
    VOCAB = 64      # input_size
    HIDDEN = 32     # hidden_size
    BATCH = 4
    SEQ = 5

    key = jax.random.PRNGKey(0)
    k_par, k_tok, k_hid = jax.random.split(key, 3)

    kernel_params, ref_params = init_params(k_par, input_size=VOCAB, hidden_size=HIDDEN)
    tokens = jax.random.randint(k_tok, (BATCH, SEQ), 0, VOCAB, dtype=jnp.int32)
    hidden0 = jax.random.normal(k_hid, (1, BATCH, HIDDEN), jnp.float32)

    output, hidden_out = encoder_rnn_forward(tokens, hidden0, kernel_params,
                                             hidden_size=HIDDEN)
    jax.block_until_ready((output, hidden_out))

    ref_out, ref_hid = reference_forward(tokens, hidden0, ref_params, hidden_size=HIDDEN)
    # bf16 MXU inputs (fused table, W_hh, per-step h) with f32 accumulation/gate math
    # vs an all-f32 reference -> 2e-2 tolerance.
    np.testing.assert_allclose(np.asarray(output), np.asarray(ref_out), rtol=2e-2, atol=2e-2)
    np.testing.assert_allclose(np.asarray(hidden_out), np.asarray(ref_hid), rtol=2e-2, atol=2e-2)

    print("KERNEL_OK")
</pallas_src>

<mosaic_0001>
module attributes {stable_mosaic.version = 11 : i64} {
  func.func @encoder_gru_kernel(%arg0: memref<40x1xi32, #tpu.memory_space<vmem>>, %arg1: memref<128x384xbf16, #tpu.memory_space<vmem>>, %arg2: memref<128x384xbf16, #tpu.memory_space<vmem>>, %arg3: memref<1x384xf32, #tpu.memory_space<vmem>>, %arg4: memref<1x128xf32, #tpu.memory_space<vmem>>, %arg5: memref<8x128xf32, #tpu.memory_space<vmem>>, %arg6: memref<5x8x128xf32, #tpu.memory_space<vmem>>, %arg7: memref<8x128xf32, #tpu.memory_space<vmem>>) attributes {dimension_semantics = [], scalar_prefetch = 0 : i64, scratch_operands = 0 : i64, tpu.core_type = #tpu.core_type<tc>} {
    %c0 = arith.constant 0 : index
    %c0_0 = arith.constant 0 : index
    %0 = vector.load %arg0[%c0, %c0_0] : memref<40x1xi32, #tpu.memory_space<vmem>>, vector<40x1xi32>
    %1 = tpu.iota {dimensions = array<i32: 1>} : vector<40x128xi32>
    %2 = vector.broadcast %0 : vector<40x1xi32> to vector<40x128xi32>
    %3 = arith.cmpi eq, %1, %2 : vector<40x128xi32>
    %4 = arith.extui %3 : vector<40x128xi1> to vector<40x128xi32>
    %5 = arith.sitofp %4 : vector<40x128xi32> to vector<40x128xf32>
    %6 = arith.truncf %5 : vector<40x128xf32> to vector<40x128xbf16>
    %c0_1 = arith.constant 0 : index
    %c0_2 = arith.constant 0 : index
    %7 = vector.load %arg1[%c0_1, %c0_2] : memref<128x384xbf16, #tpu.memory_space<vmem>>, vector<128x384xbf16>
    %cst = arith.constant dense<0.000000e+00> : vector<40x384xf32>
    %8 = tpu.matmul %6, %7, %cst {dimension_numbers = #tpu.dot_dimension_numbers<[1], [0], [0], [1], [0, 0, 1, 1], [], []>} : vector<40x128xbf16>, vector<128x384xbf16>, vector<40x384xf32> -> vector<40x384xf32>
    %c0_3 = arith.constant 0 : index
    %c0_4 = arith.constant 0 : index
    %9 = vector.load %arg3[%c0_3, %c0_4] : memref<1x384xf32, #tpu.memory_space<vmem>>, vector<1x384xf32>
    %10 = vector.broadcast %9 : vector<1x384xf32> to vector<40x384xf32>
    %11 = arith.addf %8, %10 : vector<40x384xf32>
    %c0_5 = arith.constant 0 : index
    %c0_6 = arith.constant 0 : index
    %12 = vector.load %arg2[%c0_5, %c0_6] : memref<128x384xbf16, #tpu.memory_space<vmem>>, vector<128x384xbf16>
    %c0_7 = arith.constant 0 : index
    %c0_8 = arith.constant 0 : index
    %13 = vector.load %arg4[%c0_7, %c0_8] : memref<1x128xf32, #tpu.memory_space<vmem>>, vector<1x128xf32>
    %14 = vector.shape_cast %13 : vector<1x128xf32> to vector<1x128xf32>
    %15 = vector.broadcast %14 : vector<1x128xf32> to vector<8x128xf32>
    %c0_9 = arith.constant 0 : index
    %c0_10 = arith.constant 0 : index
    %16 = vector.load %arg5[%c0_9, %c0_10] : memref<8x128xf32, #tpu.memory_space<vmem>>, vector<8x128xf32>
    %17 = vector.extract_strided_slice %11 {offsets = [0, 0], sizes = [8, 384], strides = [1, 1]} : vector<40x384xf32> to vector<8x384xf32>
    %18 = arith.truncf %16 : vector<8x128xf32> to vector<8x128xbf16>
    %cst_11 = arith.constant dense<0.000000e+00> : vector<8x384xf32>
    %19 = tpu.matmul %18, %12, %cst_11 {dimension_numbers = #tpu.dot_dimension_numbers<[1], [0], [0], [1], [0, 0, 1, 1], [], []>} : vector<8x128xbf16>, vector<128x384xbf16>, vector<8x384xf32> -> vector<8x384xf32>
    %20 = vector.extract_strided_slice %17 {offsets = [0, 0], sizes = [8, 128], strides = [1, 1]} : vector<8x384xf32> to vector<8x128xf32>
    %21 = vector.extract_strided_slice %19 {offsets = [0, 0], sizes = [8, 128], strides = [1, 1]} : vector<8x384xf32> to vector<8x128xf32>
    %22 = arith.addf %20, %21 : vector<8x128xf32>
    %23 = arith.negf %22 : vector<8x128xf32>
    %24 = math.exp %23 : vector<8x128xf32>
    %cst_12 = arith.constant 1.000000e+00 : f32
    %25 = vector.broadcast %cst_12 : f32 to vector<8x128xf32>
    %26 = arith.addf %25, %24 : vector<8x128xf32>
    %27 = arith.divf %25, %26 : vector<8x128xf32>
    %28 = vector.extract_strided_slice %17 {offsets = [0, 128], sizes = [8, 128], strides = [1, 1]} : vector<8x384xf32> to vector<8x128xf32>
    %29 = vector.extract_strided_slice %19 {offsets = [0, 128], sizes = [8, 128], strides = [1, 1]} : vector<8x384xf32> to vector<8x128xf32>
    %30 = arith.addf %28, %29 : vector<8x128xf32>
    %31 = arith.negf %30 : vector<8x128xf32>
    %32 = math.exp %31 : vector<8x128xf32>
    %cst_13 = arith.constant 1.000000e+00 : f32
    %33 = vector.broadcast %cst_13 : f32 to vector<8x128xf32>
    %34 = arith.addf %33, %32 : vector<8x128xf32>
    %35 = arith.divf %33, %34 : vector<8x128xf32>
    %36 = vector.extract_strided_slice %17 {offsets = [0, 256], sizes = [8, 128], strides = [1, 1]} : vector<8x384xf32> to vector<8x128xf32>
    %37 = vector.extract_strided_slice %19 {offsets = [0, 256], sizes = [8, 128], strides = [1, 1]} : vector<8x384xf32> to vector<8x128xf32>
    %38 = arith.addf %37, %15 : vector<8x128xf32>
    %39 = arith.mulf %27, %38 : vector<8x128xf32>
    %40 = arith.addf %36, %39 : vector<8x128xf32>
    %41 = math.tanh %40 : vector<8x128xf32>
    %cst_14 = arith.constant 1.000000e+00 : f32
    %42 = vector.broadcast %cst_14 : f32 to vector<8x128xf32>
    %43 = arith.subf %42, %35 : vector<8x128xf32>
    %44 = arith.mulf %43, %41 : vector<8x128xf32>
    %45 = arith.mulf %35, %16 : vector<8x128xf32>
    %46 = arith.addf %44, %45 : vector<8x128xf32>
    %c0_15 = arith.constant 0 : index
    %c0_16 = arith.constant 0 : index
    %c0_17 = arith.constant 0 : index
    %47 = vector.load %arg6[%c0_15, %c0_16, %c0_17] : memref<5x8x128xf32, #tpu.memory_space<vmem>>, vector<1x8x128xf32>
    %48 = vector.shape_cast %47 : vector<1x8x128xf32> to vector<8x128xf32>
    %49 = vector.shape_cast %46 : vector<8x128xf32> to vector<1x8x128xf32>
    tpu.vector_store %arg6[%c0_15, %c0_16, %c0_17], %49 {strides = array<i32>} : memref<5x8x128xf32, #tpu.memory_space<vmem>>, vector<1x8x128xf32>,
    %50 = vector.extract_strided_slice %11 {offsets = [8, 0], sizes = [8, 384], strides = [1, 1]} : vector<40x384xf32> to vector<8x384xf32>
    %51 = arith.truncf %46 : vector<8x128xf32> to vector<8x128xbf16>
    %cst_18 = arith.constant dense<0.000000e+00> : vector<8x384xf32>
    %52 = tpu.matmul %51, %12, %cst_18 {dimension_numbers = #tpu.dot_dimension_numbers<[1], [0], [0], [1], [0, 0, 1, 1], [], []>} : vector<8x128xbf16>, vector<128x384xbf16>, vector<8x384xf32> -> vector<8x384xf32>
    %53 = vector.extract_strided_slice %50 {offsets = [0, 0], sizes = [8, 128], strides = [1, 1]} : vector<8x384xf32> to vector<8x128xf32>
    %54 = vector.extract_strided_slice %52 {offsets = [0, 0], sizes = [8, 128], strides = [1, 1]} : vector<8x384xf32> to vector<8x128xf32>
    %55 = arith.addf %53, %54 : vector<8x128xf32>
    %56 = arith.negf %55 : vector<8x128xf32>
    %57 = math.exp %56 : vector<8x128xf32>
    %cst_19 = arith.constant 1.000000e+00 : f32
    %58 = vector.broadcast %cst_19 : f32 to vector<8x128xf32>
    %59 = arith.addf %58, %57 : vector<8x128xf32>
    %60 = arith.divf %58, %59 : vector<8x128xf32>
    %61 = vector.extract_strided_slice %50 {offsets = [0, 128], sizes = [8, 128], strides = [1, 1]} : vector<8x384xf32> to vector<8x128xf32>
    %62 = vector.extract_strided_slice %52 {offsets = [0, 128], sizes = [8, 128], strides = [1, 1]} : vector<8x384xf32> to vector<8x128xf32>
    %63 = arith.addf %61, %62 : vector<8x128xf32>
    %64 = arith.negf %63 : vector<8x128xf32>
    %65 = math.exp %64 : vector<8x128xf32>
    %cst_20 = arith.constant 1.000000e+00 : f32
    %66 = vector.broadcast %cst_20 : f32 to vector<8x128xf32>
    %67 = arith.addf %66, %65 : vector<8x128xf32>
    %68 = arith.divf %66, %67 : vector<8x128xf32>
    %69 = vector.extract_strided_slice %50 {offsets = [0, 256], sizes = [8, 128], strides = [1, 1]} : vector<8x384xf32> to vector<8x128xf32>
    %70 = vector.extract_strided_slice %52 {offsets = [0, 256], sizes = [8, 128], strides = [1, 1]} : vector<8x384xf32> to vector<8x128xf32>
    %71 = arith.addf %70, %15 : vector<8x128xf32>
    %72 = arith.mulf %60, %71 : vector<8x128xf32>
    %73 = arith.addf %69, %72 : vector<8x128xf32>
    %74 = math.tanh %73 : vector<8x128xf32>
    %cst_21 = arith.constant 1.000000e+00 : f32
    %75 = vector.broadcast %cst_21 : f32 to vector<8x128xf32>
    %76 = arith.subf %75, %68 : vector<8x128xf32>
    %77 = arith.mulf %76, %74 : vector<8x128xf32>
    %78 = arith.mulf %68, %46 : vector<8x128xf32>
    %79 = arith.addf %77, %78 : vector<8x128xf32>
    %c1 = arith.constant 1 : index
    %c0_22 = arith.constant 0 : index
    %c0_23 = arith.constant 0 : index
    %80 = vector.load %arg6[%c1, %c0_22, %c0_23] : memref<5x8x128xf32, #tpu.memory_space<vmem>>, vector<1x8x128xf32>
    %81 = vector.shape_cast %80 : vector<1x8x128xf32> to vector<8x128xf32>
    %82 = vector.shape_cast %79 : vector<8x128xf32> to vector<1x8x128xf32>
    tpu.vector_store %arg6[%c1, %c0_22, %c0_23], %82 {strides = array<i32>} : memref<5x8x128xf32, #tpu.memory_space<vmem>>, vector<1x8x128xf32>,
    %83 = vector.extract_strided_slice %11 {offsets = [16, 0], sizes = [8, 384], strides = [1, 1]} : vector<40x384xf32> to vector<8x384xf32>
    %84 = arith.truncf %79 : vector<8x128xf32> to vector<8x128xbf16>
    %cst_24 = arith.constant dense<0.000000e+00> : vector<8x384xf32>
    %85 = tpu.matmul %84, %12, %cst_24 {dimension_numbers = #tpu.dot_dimension_numbers<[1], [0], [0], [1], [0, 0, 1, 1], [], []>} : vector<8x128xbf16>, vector<128x384xbf16>, vector<8x384xf32> -> vector<8x384xf32>
    %86 = vector.extract_strided_slice %83 {offsets = [0, 0], sizes = [8, 128], strides = [1, 1]} : vector<8x384xf32> to vector<8x128xf32>
    %87 = vector.extract_strided_slice %85 {offsets = [0, 0], sizes = [8, 128], strides = [1, 1]} : vector<8x384xf32> to vector<8x128xf32>
    %88 = arith.addf %86, %87 : vector<8x128xf32>
    %89 = arith.negf %88 : vector<8x128xf32>
    %90 = math.exp %89 : vector<8x128xf32>
    %cst_25 = arith.constant 1.000000e+00 : f32
    %91 = vector.broadcast %cst_25 : f32 to vector<8x128xf32>
    %92 = arith.addf %91, %90 : vector<8x128xf32>
    %93 = arith.divf %91, %92 : vector<8x128xf32>
    %94 = vector.extract_strided_slice %83 {offsets = [0, 128], sizes = [8, 128], strides = [1, 1]} : vector<8x384xf32> to vector<8x128xf32>
    %95 = vector.extract_strided_slice %85 {offsets = [0, 128], sizes = [8, 128], strides = [1, 1]} : vector<8x384xf32> to vector<8x128xf32>
    %96 = arith.addf %94, %95 : vector<8x128xf32>
    %97 = arith.negf %96 : vector<8x128xf32>
    %98 = math.exp %97 : vector<8x128xf32>
    %cst_26 = arith.constant 1.000000e+00 : f32
    %99 = vector.broadcast %cst_26 : f32 to vector<8x128xf32>
    %100 = arith.addf %99, %98 : vector<8x128xf32>
    %101 = arith.divf %99, %100 : vector<8x128xf32>
    %102 = vector.extract_strided_slice %83 {offsets = [0, 256], sizes = [8, 128], strides = [1, 1]} : vector<8x384xf32> to vector<8x128xf32>
    %103 = vector.extract_strided_slice %85 {offsets = [0, 256], sizes = [8, 128], strides = [1, 1]} : vector<8x384xf32> to vector<8x128xf32>
    %104 = arith.addf %103, %15 : vector<8x128xf32>
    %105 = arith.mulf %93, %104 : vector<8x128xf32>
    %106 = arith.addf %102, %105 : vector<8x128xf32>
    %107 = math.tanh %106 : vector<8x128xf32>
    %cst_27 = arith.constant 1.000000e+00 : f32
    %108 = vector.broadcast %cst_27 : f32 to vector<8x128xf32>
    %109 = arith.subf %108, %101 : vector<8x128xf32>
    %110 = arith.mulf %109, %107 : vector<8x128xf32>
    %111 = arith.mulf %101, %79 : vector<8x128xf32>
    %112 = arith.addf %110, %111 : vector<8x128xf32>
    %c2 = arith.constant 2 : index
    %c0_28 = arith.constant 0 : index
    %c0_29 = arith.constant 0 : index
    %113 = vector.load %arg6[%c2, %c0_28, %c0_29] : memref<5x8x128xf32, #tpu.memory_space<vmem>>, vector<1x8x128xf32>
    %114 = vector.shape_cast %113 : vector<1x8x128xf32> to vector<8x128xf32>
    %115 = vector.shape_cast %112 : vector<8x128xf32> to vector<1x8x128xf32>
    tpu.vector_store %arg6[%c2, %c0_28, %c0_29], %115 {strides = array<i32>} : memref<5x8x128xf32, #tpu.memory_space<vmem>>, vector<1x8x128xf32>,
    %116 = vector.extract_strided_slice %11 {offsets = [24, 0], sizes = [8, 384], strides = [1, 1]} : vector<40x384xf32> to vector<8x384xf32>
    %117 = arith.truncf %112 : vector<8x128xf32> to vector<8x128xbf16>
    %cst_30 = arith.constant dense<0.000000e+00> : vector<8x384xf32>
    %118 = tpu.matmul %117, %12, %cst_30 {dimension_numbers = #tpu.dot_dimension_numbers<[1], [0], [0], [1], [0, 0, 1, 1], [], []>} : vector<8x128xbf16>, vector<128x384xbf16>, vector<8x384xf32> -> vector<8x384xf32>
    %119 = vector.extract_strided_slice %116 {offsets = [0, 0], sizes = [8, 128], strides = [1, 1]} : vector<8x384xf32> to vector<8x128xf32>
    %120 = vector.extract_strided_slice %118 {offsets = [0, 0], sizes = [8, 128], strides = [1, 1]} : vector<8x384xf32> to vector<8x128xf32>
    %121 = arith.addf %119, %120 : vector<8x128xf32>
    %122 = arith.negf %121 : vector<8x128xf32>
    %123 = math.exp %122 : vector<8x128xf32>
    %cst_31 = arith.constant 1.000000e+00 : f32
    %124 = vector.broadcast %cst_31 : f32 to vector<8x128xf32>
    %125 = arith.addf %124, %123 : vector<8x128xf32>
    %126 = arith.divf %124, %125 : vector<8x128xf32>
    %127 = vector.extract_strided_slice %116 {offsets = [0, 128], sizes = [8, 128], strides = [1, 1]} : vector<8x384xf32> to vector<8x128xf32>
    %128 = vector.extract_strided_slice %118 {offsets = [0, 128], sizes = [8, 128], strides = [1, 1]} : vector<8x384xf32> to vector<8x128xf32>
    %129 = arith.addf %127, %128 : vector<8x128xf32>
    %130 = arith.negf %129 : vector<8x128xf32>
    %131 = math.exp %130 : vector<8x128xf32>
    %cst_32 = arith.constant 1.000000e+00 : f32
    %132 = vector.broadcast %cst_32 : f32 to vector<8x128xf32>
    %133 = arith.addf %132, %131 : vector<8x128xf32>
    %134 = arith.divf %132, %133 : vector<8x128xf32>
    %135 = vector.extract_strided_slice %116 {offsets = [0, 256], sizes = [8, 128], strides = [1, 1]} : vector<8x384xf32> to vector<8x128xf32>
    %136 = vector.extract_strided_slice %118 {offsets = [0, 256], sizes = [8, 128], strides = [1, 1]} : vector<8x384xf32> to vector<8x128xf32>
    %137 = arith.addf %136, %15 : vector<8x128xf32>
    %138 = arith.mulf %126, %137 : vector<8x128xf32>
    %139 = arith.addf %135, %138 : vector<8x128xf32>
    %140 = math.tanh %139 : vector<8x128xf32>
    %cst_33 = arith.constant 1.000000e+00 : f32
    %141 = vector.broadcast %cst_33 : f32 to vector<8x128xf32>
    %142 = arith.subf %141, %134 : vector<8x128xf32>
    %143 = arith.mulf %142, %140 : vector<8x128xf32>
    %144 = arith.mulf %134, %112 : vector<8x128xf32>
    %145 = arith.addf %143, %144 : vector<8x128xf32>
    %c3 = arith.constant 3 : index
    %c0_34 = arith.constant 0 : index
    %c0_35 = arith.constant 0 : index
    %146 = vector.load %arg6[%c3, %c0_34, %c0_35] : memref<5x8x128xf32, #tpu.memory_space<vmem>>, vector<1x8x128xf32>
    %147 = vector.shape_cast %146 : vector<1x8x128xf32> to vector<8x128xf32>
    %148 = vector.shape_cast %145 : vector<8x128xf32> to vector<1x8x128xf32>
    tpu.vector_store %arg6[%c3, %c0_34, %c0_35], %148 {strides = array<i32>} : memref<5x8x128xf32, #tpu.memory_space<vmem>>, vector<1x8x128xf32>,
    %149 = vector.extract_strided_slice %11 {offsets = [32, 0], sizes = [8, 384], strides = [1, 1]} : vector<40x384xf32> to vector<8x384xf32>
    %150 = arith.truncf %145 : vector<8x128xf32> to vector<8x128xbf16>
    %cst_36 = arith.constant dense<0.000000e+00> : vector<8x384xf32>
    %151 = tpu.matmul %150, %12, %cst_36 {dimension_numbers = #tpu.dot_dimension_numbers<[1], [0], [0], [1], [0, 0, 1, 1], [], []>} : vector<8x128xbf16>, vector<128x384xbf16>, vector<8x384xf32> -> vector<8x384xf32>
    %152 = vector.extract_strided_slice %149 {offsets = [0, 0], sizes = [8, 128], strides = [1, 1]} : vector<8x384xf32> to vector<8x128xf32>
    %153 = vector.extract_strided_slice %151 {offsets = [0, 0], sizes = [8, 128], strides = [1, 1]} : vector<8x384xf32> to vector<8x128xf32>
    %154 = arith.addf %152, %153 : vector<8x128xf32>
    %155 = arith.negf %154 : vector<8x128xf32>
    %156 = math.exp %155 : vector<8x128xf32>
    %cst_37 = arith.constant 1.000000e+00 : f32
    %157 = vector.broadcast %cst_37 : f32 to vector<8x128xf32>
    %158 = arith.addf %157, %156 : vector<8x128xf32>
    %159 = arith.divf %157, %158 : vector<8x128xf32>
    %160 = vector.extract_strided_slice %149 {offsets = [0, 128], sizes = [8, 128], strides = [1, 1]} : vector<8x384xf32> to vector<8x128xf32>
    %161 = vector.extract_strided_slice %151 {offsets = [0, 128], sizes = [8, 128], strides = [1, 1]} : vector<8x384xf32> to vector<8x128xf32>
    %162 = arith.addf %160, %161 : vector<8x128xf32>
    %163 = arith.negf %162 : vector<8x128xf32>
    %164 = math.exp %163 : vector<8x128xf32>
    %cst_38 = arith.constant 1.000000e+00 : f32
    %165 = vector.broadcast %cst_38 : f32 to vector<8x128xf32>
    %166 = arith.addf %165, %164 : vector<8x128xf32>
    %167 = arith.divf %165, %166 : vector<8x128xf32>
    %168 = vector.extract_strided_slice %149 {offsets = [0, 256], sizes = [8, 128], strides = [1, 1]} : vector<8x384xf32> to vector<8x128xf32>
    %169 = vector.extract_strided_slice %151 {offsets = [0, 256], sizes = [8, 128], strides = [1, 1]} : vector<8x384xf32> to vector<8x128xf32>
    %170 = arith.addf %169, %15 : vector<8x128xf32>
    %171 = arith.mulf %159, %170 : vector<8x128xf32>
    %172 = arith.addf %168, %171 : vector<8x128xf32>
    %173 = math.tanh %172 : vector<8x128xf32>
    %cst_39 = arith.constant 1.000000e+00 : f32
    %174 = vector.broadcast %cst_39 : f32 to vector<8x128xf32>
    %175 = arith.subf %174, %167 : vector<8x128xf32>
    %176 = arith.mulf %175, %173 : vector<8x128xf32>
    %177 = arith.mulf %167, %145 : vector<8x128xf32>
    %178 = arith.addf %176, %177 : vector<8x128xf32>
    %c4 = arith.constant 4 : index
    %c0_40 = arith.constant 0 : index
    %c0_41 = arith.constant 0 : index
    %179 = vector.load %arg6[%c4, %c0_40, %c0_41] : memref<5x8x128xf32, #tpu.memory_space<vmem>>, vector<1x8x128xf32>
    %180 = vector.shape_cast %179 : vector<1x8x128xf32> to vector<8x128xf32>
    %181 = vector.shape_cast %178 : vector<8x128xf32> to vector<1x8x128xf32>
    tpu.vector_store %arg6[%c4, %c0_40, %c0_41], %181 {strides = array<i32>} : memref<5x8x128xf32, #tpu.memory_space<vmem>>, vector<1x8x128xf32>,
    %c0_42 = arith.constant 0 : index
    %c0_43 = arith.constant 0 : index
    %182 = vector.load %arg7[%c0_42, %c0_43] : memref<8x128xf32, #tpu.memory_space<vmem>>, vector<8x128xf32>
    tpu.vector_store %arg7[%c0_42, %c0_43], %178 {strides = array<i32>} : memref<8x128xf32, #tpu.memory_space<vmem>>, vector<8x128xf32>,
    return
  }
}

</mosaic_0001>

<bundles_post_ra>
// kernel: encoder_rnn_forward.1
= control target key start
LH: loop header
LB: loop body
LE: loop exit
PB: predicated region body
PF: predicated region fallthrough
CT: control target
= control target key end

     0   :  { %13 = vsyncpa [#allocation3], 0  ;;  %s1970_s0 = inlined_call_operand.vmem [shape: s32[40,1], index: 0, kind: input, shape index: {}]   ;;  %s1971_s1 = inlined_call_operand.hbm [shape: bf16[128,384], index: 1, kind: input, shape index: {}]   ;;  %s1972_s2 = inlined_call_operand.hbm [shape: bf16[128,384], index: 2, kind: input, shape index: {}]   ;;  %s1973_s3 = inlined_call_operand.vmem [shape: f32[1,384], index: 3, kind: input, shape index: {}]   ;;  %s1974_s4 = inlined_call_operand.vmem [shape: f32[1,128], index: 4, kind: input, shape index: {}]   ;;  %s1975_s5 = inlined_call_operand.vmem [shape: f32[8,128], index: 5, kind: input, shape index: {}]   ;;  %s1976_s6 = inlined_call_operand.vmem [shape: f32[5,8,128], index: 6, kind: output, shape index: {0}]   ;;  %s1977_s7 = inlined_call_operand.vmem [shape: f32[8,128], index: 7, kind: output, shape index: {1}]  }
   0x1   :  { %14 = vsyncpa [#allocation5], 0  ;;  %s1538_s24 = smov [#allocation2]   ;;  %s1490_s28 = scalar_lea.hbm %s1971_s1, 3072 }
   0x2   :  { %s22_s25 = sshll.u32 %s1538_s24, 4  ;;  %p1491_p0 = scmp.ne.s32.totalorder %s1971_s1, %s1490_s28  ;;  %s23_s25 = int_to_ptr.vmem [resolvable:$true] %s22_s25 }
   0x3   :  { %p1494_p1 = scmp.lt.u32.totalorder %s1490_s28, %s1971_s1 }
   0x5   :  { %p1496_p2 = pnand %p1494_p1, %p1491_p0 }
   0x7   :  { %1499 = shalt.err (!%p1496_p2)
}
   0x8   :  { %s1500_s10 = scalar_lea.vmem %s23_s25, 3072  ;;  %p1505_p4 = scmp.lt.s32.totalorder %s23_s25, %s23_s25 }
   0x9   :  { %p1501_p3 = scmp.ne.s32.totalorder %s23_s25, %s1500_s10  ;;  %p1506_p5 = scmp.lt.s32.totalorder %s1500_s10, %s1500_s10 }
   0xb   :  { %p1507_p6 = por %p1506_p5, %p1505_p4 }
   0xd   :  { %p1508_p7 = pnand %p1507_p6, %p1501_p3 }
   0xf   :  { %1511 = shalt.err (!%p1508_p7)
}
  0x10   :  { %s1539_s11 = smov 192   ;;  %s1540_s12 = smov 12  }
  0x11   :  { %28 = dma.hbm_to_vmem [thread:$0]  %s1971_s1, 3072, %s23_s25, [#allocation3], %s1539_s11, %s1539_s11, %s1540_s12  }
  0x12   :  { %s1541_s15 = smov [#allocation4]   ;;  %s1512_s19 = scalar_lea.hbm %s1972_s2, 3072 }
  0x13   :  { %s34_s16 = sshll.u32 %s1541_s15, 4  ;;  %p1513_p8 = scmp.ne.s32.totalorder %s1972_s2, %s1512_s19  ;;  %s35_s16 = int_to_ptr.vmem [resolvable:$true] %s34_s16 }
  0x14   :  { %p1516_p9 = scmp.lt.u32.totalorder %s1512_s19, %s1972_s2 }
  0x16   :  { %p1518_p10 = pnand %p1516_p9, %p1513_p8 }
  0x18   :  { %1521 = shalt.err (!%p1518_p10)
}
  0x19   :  { %s1522_s24 = scalar_lea.vmem %s35_s16, 3072  ;;  %p1527_p12 = scmp.lt.s32.totalorder %s35_s16, %s35_s16 }
  0x1a   :  { %p1523_p11 = scmp.ne.s32.totalorder %s35_s16, %s1522_s24  ;;  %p1528_p13 = scmp.lt.s32.totalorder %s1522_s24, %s1522_s24 }
  0x1c   :  { %p1529_p0 = por %p1528_p13, %p1527_p12 }
  0x1e   :  { %p1530_p1 = pnand %p1529_p0, %p1523_p11 }
  0x20   :  { %1533 = shalt.err (!%p1530_p1)
}
  0x21   :  { %40 = dma.hbm_to_vmem [thread:$0]  %s1972_s2, 3072, %s35_s16, [#allocation5], %s1539_s11, %s1539_s11, %s1540_s12  }
  0x22   :  { %1534 = dma.done.wait [#allocation3], 3072  }
  0x23   :  { %1535 = vsyncadd [#allocation3], 4294964224 }
  0x24   :  { %1536 = dma.done.wait [#allocation5], 3072  }
  0x25   :  { %1537 = vsyncadd [#allocation5], 4294964224  ;;  %v1542_v0 = vmov 0   ;;  %v1543_v1 = vmov 0.0   ;;  %v54_v2 = vld [vmem:[%s1970_s0] sm:$0xff]  ;;  %v56_v3 = vld [vmem:[%s1970_s0 + $0x10] sm:$0xff]  ;;  %v59_v32 = vlaneseq }
  0x26   :  { %1374 = vset.pattern.permute.xlu0 %v1542_v0  ;;  %1375 = vset.pattern.permute.xlu1 %v1542_v0  ;;  %v55_v4 = vld [vmem:[%s1970_s0 + $0x8] sm:$0xff]  ;;  %v57_v5 = vld [vmem:[%s1970_s0 + $0x18] sm:$0xff]  ;;  %v1376_v6 = vld [vmem:[#allocation2 + $0x4] ss:$12 sps:$4 sm:$0xff]   ;;  %vm1544_vm0 = vmmov 0  }
  0x27   :  { %1232 = vmatprep.subr.bf16.mxu1 %v1543_v1  ;;  %303 = vmatprep.mubr.bf16.mxu0 %v1542_v0  ;;  %v1378_v7 = vld [vmem:[#allocation2] ss:$12 sps:$4 sm:$0xff]   ;;  %v1379_v8 = vld [vmem:[#allocation2 + $0x8] ss:$12 sps:$4 sm:$0xff]   ;;  %v1382_v11 = vld [vmem:[#allocation2 + $0x18] ss:$12 sps:$4 sm:$0xff]  }
  0x28   :  { %62 = vperm.xlu0 %1374, %v54_v2   ;;  %68 = vperm.xlu1 %1375, %v56_v3   ;;  %v58_v9 = vld [vmem:[%s1970_s0 + $0x20] sm:$0xff]  ;;  %v1380_v10 = vld [vmem:[#allocation2 + $0x1c] ss:$12 sps:$4 sm:$0xff]   ;;  %v1388_v16 = vld [vmem:[#allocation2 + $0x4c] ss:$12 sps:$4 sm:$0xff]   ;;  %v60_v35 = vand.u32 127, %v59_v32 }
  0x29   :  { %271 = vmatprep.subr.bf16.mxu0 %v1376_v6  ;;  %1233 = vmatpush3.bf16.msra.mxu1 %v1379_v8  ;;  %v1383_v12 = vld [vmem:[#allocation2 + $0x20] ss:$12 sps:$4 sm:$0xff]   ;;  %v1386_v14 = vld [vmem:[#allocation2 + $0x30] ss:$12 sps:$4 sm:$0xff]   ;;  %v1387_v15 = vld [vmem:[#allocation2 + $0x38] ss:$12 sps:$4 sm:$0xff]  }
  0x2a   :  { %272 = vmatpush1.bf16.msra.mxu0 %v1378_v7  ;;  %1234 = vmatprep.subr.bf16.mxu1 %v1543_v1  ;;  %v1384_v13 = vld [vmem:[#allocation2 + $0x34] ss:$12 sps:$4 sm:$0xff]   ;;  %v1391_v18 = vld [vmem:[#allocation2 + $0x50] ss:$12 sps:$4 sm:$0xff]   ;;  %v1398_v23 = vld [vmem:[#allocation2 + $0x78] ss:$12 sps:$4 sm:$0xff]  }
  0x2b   :  { %273 = vmatprep.subr.bf16.mxu0 %v1380_v10  ;;  %1248 = vmatprep.mubr.msk.bf16.mxu1 %vm1544_vm0, %v1543_v1  ;;  %v1390_v17 = vld [vmem:[#allocation2 + $0x48] ss:$12 sps:$4 sm:$0xff]   ;;  %v1392_v19 = vld [vmem:[#allocation2 + $0x64] ss:$12 sps:$4 sm:$0xff]   ;;  %v1394_v20 = vld [vmem:[#allocation2 + $0x60] ss:$12 sps:$4 sm:$0xff]  }
  0x2c   :  { %65 = vperm.xlu0 %1374, %v55_v4   ;;  %71 = vperm.xlu1 %1375, %v57_v5   ;;  %v1395_v21 = vld [vmem:[#allocation2 + $0x68] ss:$12 sps:$4 sm:$0xff]   ;;  %v1399_v24 = vld [vmem:[#allocation2 + $0x80] ss:$12 sps:$4 sm:$0xff]   ;;  %v1402_v26 = vld [vmem:[#allocation2 + $0x90] ss:$12 sps:$4 sm:$0xff]  }
  0x2d   :  { %1235 = vmatpush3.bf16.msra.mxu1 %v1383_v12  ;;  %v1396_v22 = vld [vmem:[#allocation2 + $0x7c] ss:$12 sps:$4 sm:$0xff]   ;;  %v1400_v25 = vld [vmem:[#allocation2 + $0x94] ss:$12 sps:$4 sm:$0xff]   ;;  %v1403_v27 = vld [vmem:[#allocation2 + $0x98] ss:$12 sps:$4 sm:$0xff]  }
  0x2e   :  { %274 = vmatpush1.bf16.msra.mxu0 %v1382_v11  ;;  %1236 = vmatprep.subr.bf16.mxu1 %v1543_v1  ;;  %v1404_v28 = vld [vmem:[#allocation2 + $0xac] ss:$12 sps:$4 sm:$0xff]   ;;  %v1406_v29 = vld [vmem:[#allocation2 + $0xa8] ss:$12 sps:$4 sm:$0xff]   ;;  %v1407_v30 = vld [vmem:[#allocation2 + $0xb0] ss:$12 sps:$4 sm:$0xff]  }
  0x2f   :  { %275 = vmatprep.subr.bf16.mxu0 %v1384_v13  ;;  %v1637_v31 = vld [vmem:[#allocation4 + $0x4] ss:$12 sps:$4 sm:$0xff]   ;;  %v1643_v37 = vld [vmem:[#allocation4] ss:$12 sps:$4 sm:$0xff]   ;;  %v1645_v38 = vld [vmem:[#allocation4 + $0x1c] ss:$12 sps:$4 sm:$0xff]  }
  0x30   :  { %74 = vperm.xlu0 %1374, %v58_v9   ;;  %v1647_v40 = vld [vmem:[#allocation4 + $0x8] ss:$12 sps:$4 sm:$0xff]   ;;  %v1545_v41 = vmov 1.0|1.0   ;;  %v1650_v42 = vld [vmem:[#allocation4 + $0x18] ss:$12 sps:$4 sm:$0xff]  }
  0x31   :  { %1237 = vmatpush3.bf16.msra.mxu1 %v1387_v15  ;;  %v1656_v43 = vld [vmem:[#allocation4 + $0x34] ss:$12 sps:$4 sm:$0xff]   ;;  %v1663_v45 = vld [vmem:[#allocation4 + $0x30] ss:$12 sps:$4 sm:$0xff]   ;;  %v1666_v46 = vld [vmem:[#allocation4 + $0x4c] ss:$12 sps:$4 sm:$0xff]  }
  0x32   :  { %276 = vmatpush1.bf16.msra.mxu0 %v1386_v14  ;;  %1238 = vmatprep.subr.bf16.mxu1 %v1543_v1  ;;  %v1659_v44 = vld [vmem:[#allocation4 + $0x20] ss:$12 sps:$4 sm:$0xff]   ;;  %v1669_v47 = vld [vmem:[#allocation4 + $0x38] ss:$12 sps:$4 sm:$0xff]   ;;  %v1672_v49 = vld [vmem:[#allocation4 + $0x48] ss:$12 sps:$4 sm:$0xff]  }
  0x33   :  { %277 = vmatprep.subr.bf16.mxu0 %v1388_v16  ;;  %v1678_v50 = vld [vmem:[#allocation4 + $0x64] ss:$12 sps:$4 sm:$0xff]   ;;  %v1683_v51 = vld [vmem:[#allocation4 + $0x60] ss:$12 sps:$4 sm:$0xff]   ;;  %v1687_v52 = vld [vmem:[#allocation4 + $0x7c] ss:$12 sps:$4 sm:$0xff]  }
  0x34   :  { %v1689_v53 = vld [vmem:[#allocation4 + $0x50] ss:$12 sps:$4 sm:$0xff]   ;;  %v1692_v54 = vld [vmem:[#allocation4 + $0x78] ss:$12 sps:$4 sm:$0xff]   ;;  %v1696_v55 = vld [vmem:[#allocation4 + $0x94] ss:$12 sps:$4 sm:$0xff]  }
  0x35   :  { %1239 = vmatpush3.bf16.msra.mxu1 %v1391_v18  ;;  %v1699_v56 = vld [vmem:[#allocation4 + $0x68] ss:$12 sps:$4 sm:$0xff]   ;;  %v1705_v57 = vld [vmem:[#allocation4 + $0x90] ss:$12 sps:$4 sm:$0xff]   ;;  %v1708_v58 = vld [vmem:[#allocation4 + $0xac] ss:$12 sps:$4 sm:$0xff]  }
  0x36   :  { %278 = vmatpush1.bf16.msra.mxu0 %v1390_v17  ;;  %1240 = vmatprep.subr.bf16.mxu1 %v1543_v1  ;;  %v1711_v59 = vld [vmem:[#allocation4 + $0x80] ss:$12 sps:$4 sm:$0xff]   ;;  %v1715_v60 = vld [vmem:[#allocation4 + $0xa8] ss:$12 sps:$4 sm:$0xff]   ;;  %v1724_v62 = vld [vmem:[#allocation4 + $0x98] ss:$12 sps:$4 sm:$0xff]  }
  0x37   :  { %279 = vmatprep.subr.bf16.mxu0 %v1392_v19  ;;  %v1720_v61 = vld [vmem:[%s1975_s5] sm:$0xff]  ;;  %v1731_v2 = vld [vmem:[#allocation4 + $0xb0] ss:$12 sps:$4 sm:$0xff]   ;;  %v129_v3 = vshrl.u32 %v59_v32, 7 }
  0x38   :  { %v428_v63 = vpack.c.bf16 %v1720_v61, %v1720_v61  ;;  %v126_v5 = vld [vmem:[%s1973_s3] sm:$0x7] }
  0x39   :  { %1241 = vmatpush3.bf16.msra.mxu1 %v1395_v21  ;;  %v138_v4 = vsub.s32 2, %v129_v3 }
  0x3a   :  { %280 = vmatpush1.bf16.msra.mxu0 %v1394_v20  ;;  %1242 = vmatprep.subr.bf16.mxu1 %v1543_v1 }
  0x3b   :  { %281 = vmatprep.subr.bf16.mxu0 %v1396_v22  ;;  %v139_v6 = vrot.slane %v126_v5, %v138_v4 }
  0x3d   :  { %1243 = vmatpush3.bf16.msra.mxu1 %v1399_v24 }
  0x3e   :  { %282 = vmatpush1.bf16.msra.mxu0 %v1398_v23  ;;  %1244 = vmatprep.subr.bf16.mxu1 %v1543_v1 }
  0x3f   :  { %283 = vmatprep.subr.bf16.mxu0 %v1400_v25 }
  0x41   :  { %1245 = vmatpush3.bf16.msra.mxu1 %v1403_v27 }
  0x42   :  { %284 = vmatpush1.bf16.msra.mxu0 %v1402_v26  ;;  %1246 = vmatprep.subr.bf16.mxu1 %v1543_v1 }
  0x43   :  { %285 = vmatprep.subr.bf16.mxu0 %v1404_v28 }
  0x45   :  { %1247 = vmatpush3.bf16.msra.mxu1 %v1407_v30 }
  0x46   :  { %286 = vmatpush1.bf16.msra.mxu0 %v1406_v29  ;;  %1260 = vmatprep.subr.bf16.mxu1 %v1543_v1 }
  0x47   :  { %557 = vmatprep.subr.bf16.mxu0 %v1637_v31 }
  0xa7   :  { %v63_v33 = vpop.permute.xlu0 %62  ;;  %v69_v34 = vpop.permute.xlu1 %68 }
  0xa8   :  { %vm76_vm1 = vcmp.eq.s32.totalorder %v60_v35, %v63_v33  ;;  %vm78_vm4 = vcmp.eq.s32.totalorder %v60_v35, %v69_v34  ;;  %v130_v33 = vsub.s32 0, %v129_v3  ;;  %v134_v34 = vsub.s32 1, %v129_v3 }
  0xab   :  { %v66_v36 = vpop.permute.xlu0 %65  ;;  %v72_v39 = vpop.permute.xlu1 %71 }
  0xac   :  { %vm77_vm2 = vcmp.eq.s32.totalorder %v60_v35, %v66_v36  ;;  %vm79_vm5 = vcmp.eq.s32.totalorder %v60_v35, %v72_v39  ;;  %v1798_v36 = vrot.slane %v126_v5, %v134_v34 }
  0xad   :  { %vm1125_vm3 = vmpackc.low %vm77_vm2, %vm76_vm1 }
  0xae   :  { %1126 = vmatmul.mubr.msk.bf16.vlgmr.msra.gmra.mrb[0].mxu0 %vm1125_vm3, %v1545_v41  ;;  %1249 = vmatmul.mubr.msk.bf16.vlgmr.msra.gmra.mrb[0].mxu1 %vm1125_vm3, %v1545_v41  ;;  %vm1127_vm6 = vmpackc.low %vm79_vm5, %vm78_vm4 }
  0xaf   :  { %558 = vmatpush1.bf16.msra.mxu0 %v1643_v37  ;;  %313 = vmatprep.mubr.bf16.mxu0 %v1542_v0  ;;  %v75_v48 = vpop.permute.xlu0 %74 }
  0xb0   :  { %559 = vmatprep.subr.bf16.mxu0 %v1645_v38  ;;  %1252 = vmatprep.mubr.msk.bf16.mxu1 %vm1544_vm0, %v1543_v1  ;;  %vm80_vm7 = vcmp.eq.s32.totalorder %v60_v35, %v75_v48  ;;  %v1796_v35 = vrot.slane %v126_v5, %v130_v33 }
  0xb1   :  { %1261 = vmatpush3.bf16.msra.mxu1 %v1647_v40  ;;  %vm1129_vm8 = vmpackc.low %vm80_vm7, %vm80_vm7 }
  0xb2   :  { %1262 = vmatprep.subr.bf16.mxu1 %v1543_v1 }
  0xb3   :  { %560 = vmatpush1.bf16.msra.mxu0 %v1650_v42 }
  0xb4   :  { %561 = vmatprep.subr.bf16.mxu0 %v1656_v43 }
  0xb5   :  { %1263 = vmatpush3.bf16.msra.mxu1 %v1659_v44 }
  0xb6   :  { %1128 = vmatmul.mubr.msk.bf16.gmra.mrb[4].mxu0 %vm1127_vm6, %v1545_v41  ;;  %1253 = vmatmul.mubr.msk.bf16.gmra.mrb[4].mxu1 %vm1127_vm6, %v1545_v41 }
  0xb7   :  { %562 = vmatpush1.bf16.msra.mxu0 %v1663_v45  ;;  %323 = vmatprep.mubr.bf16.mxu0 %v1542_v0 }
  0xb8   :  { %563 = vmatprep.subr.bf16.mxu0 %v1666_v46  ;;  %1256 = vmatprep.mubr.msk.bf16.mxu1 %vm1544_vm0, %v1543_v1 }
  0xb9   :  { %1264 = vmatprep.subr.bf16.mxu1 %v1543_v1 }
  0xba   :  { %1265 = vmatpush3.bf16.msra.mxu1 %v1669_v47 }
  0xbb   :  { %564 = vmatpush1.bf16.msra.mxu0 %v1672_v49  ;;  %1266 = vmatprep.subr.bf16.mxu1 %v1543_v1 }
  0xbc   :  { %565 = vmatprep.subr.bf16.mxu0 %v1678_v50 }
  0xbe   :  { %1130 = vmatmul.mubr.msk.bf16.gmra.mrb[8].mxu0 %vm1129_vm8, %v1545_v41  ;;  %1257 = vmatmul.mubr.msk.bf16.gmra.mrb[8].mxu1 %vm1129_vm8, %v1545_v41 }
  0xbf   :  { %566 = vmatpush1.bf16.msra.mxu0 %v1683_v51  ;;  %589 = vmatprep.mubr.bf16.mxu0 %v1542_v0 }
  0xc0   :  { %567 = vmatprep.subr.bf16.mxu0 %v1687_v52  ;;  %1267 = vmatpush3.bf16.msra.mxu1 %v1689_v53 }
  0xc1   :  { %1268 = vmatprep.subr.bf16.mxu1 %v1543_v1  ;;  %1276 = vmatprep.mubr.msk.bf16.mxu1 %vm1544_vm0, %v1543_v1 }
  0xc3   :  { %568 = vmatpush1.bf16.msra.mxu0 %v1692_v54 }
  0xc4   :  { %569 = vmatprep.subr.bf16.mxu0 %v1696_v55  ;;  %1269 = vmatpush3.bf16.msra.mxu1 %v1699_v56 }
  0xc5   :  { %1270 = vmatprep.subr.bf16.mxu1 %v1543_v1 }
  0xc7   :  { %570 = vmatpush1.bf16.msra.mxu0 %v1705_v57 }
  0xc8   :  { %571 = vmatprep.subr.bf16.mxu0 %v1708_v58  ;;  %1271 = vmatpush3.bf16.msra.mxu1 %v1711_v59 }
  0xc9   :  { %1272 = vmatprep.subr.bf16.mxu1 %v1543_v1 }
  0xcb   :  { %572 = vmatpush1.bf16.msra.mxu0 %v1715_v60 }
  0xcc   :  { %1273 = vmatpush3.bf16.msra.mxu1 %v1724_v62  ;;  %662 = vmatprep.subr.bf16.mxu0 %v1637_v31 }
  0xcd   :  { %1274 = vmatprep.subr.bf16.mxu1 %v1543_v1 }
  0xce   :  { %590 = vmatmul.mubr.bf16.vlgmr.msra.gmra.mrb[12].mxu0 %v428_v63 }
  0xcf   :  { %663 = vmatpush1.bf16.msra.mxu0 %v1643_v37  ;;  %694 = vmatprep.mubr.bf16.mxu0 %v1542_v0 }
  0xd0   :  { %1275 = vmatpush3.bf16.msra.mxu1 %v1731_v2  ;;  %664 = vmatprep.subr.bf16.mxu0 %v1645_v38 }
  0xd1   :  { %1280 = vmatprep.subr.bf16.mxu1 %v1543_v1 }
  0xd3   :  { %1277 = vmatmul.mubr.bf16.vlgmr.msra.gmra.mrb[12].mxu1 %v428_v63  ;;  %665 = vmatpush1.bf16.msra.mxu0 %v1650_v42 }
  0xd4   :  { %1281 = vmatpush3.bf16.msra.mxu1 %v1647_v40  ;;  %666 = vmatprep.subr.bf16.mxu0 %v1656_v43 }
  0xd5   :  { %1282 = vmatprep.subr.bf16.mxu1 %v1543_v1  ;;  %1296 = vmatprep.mubr.msk.bf16.mxu1 %vm1544_vm0, %v1543_v1 }
  0xd7   :  { %667 = vmatpush1.bf16.msra.mxu0 %v1663_v45 }
  0xd8   :  { %1283 = vmatpush3.bf16.msra.mxu1 %v1659_v44  ;;  %668 = vmatprep.subr.bf16.mxu0 %v1666_v46 }
  0xd9   :  { %1284 = vmatprep.subr.bf16.mxu1 %v1543_v1 }
  0xdb   :  { %669 = vmatpush1.bf16.msra.mxu0 %v1672_v49 }
  0xdc   :  { %1285 = vmatpush3.bf16.msra.mxu1 %v1669_v47  ;;  %670 = vmatprep.subr.bf16.mxu0 %v1678_v50 }
  0xdd   :  { %1286 = vmatprep.subr.bf16.mxu1 %v1543_v1 }
  0xdf   :  { %671 = vmatpush1.bf16.msra.mxu0 %v1683_v51 }
  0xe0   :  { %1287 = vmatpush3.bf16.msra.mxu1 %v1689_v53  ;;  %672 = vmatprep.subr.bf16.mxu0 %v1687_v52 }
  0xe1   :  { %1288 = vmatprep.subr.bf16.mxu1 %v1543_v1 }
  0xe3   :  { %673 = vmatpush1.bf16.msra.mxu0 %v1692_v54 }
  0xe4   :  { %1289 = vmatpush3.bf16.msra.mxu1 %v1699_v56  ;;  %674 = vmatprep.subr.bf16.mxu0 %v1696_v55 }
  0xe5   :  { %1290 = vmatprep.subr.bf16.mxu1 %v1543_v1 }
  0xe7   :  { %675 = vmatpush1.bf16.msra.mxu0 %v1705_v57 }
  0xe8   :  { %1291 = vmatpush3.bf16.msra.mxu1 %v1711_v59  ;;  %676 = vmatprep.subr.bf16.mxu0 %v1708_v58 }
  0xe9   :  { %1292 = vmatprep.subr.bf16.mxu1 %v1543_v1 }
  0xeb   :  { %677 = vmatpush1.bf16.msra.mxu0 %v1715_v60 }
  0xec   :  { %1293 = vmatpush3.bf16.msra.mxu1 %v1724_v62  ;;  %768 = vmatprep.subr.bf16.mxu0 %v1637_v31 }
  0xed   :  { %1294 = vmatprep.subr.bf16.mxu1 %v1543_v1 }
  0xf0   :  { %1295 = vmatpush3.bf16.msra.mxu1 %v1731_v2 }
  0xf1   :  { %1300 = vmatprep.subr.bf16.mxu1 %v1543_v1 }
 0x181   :  { %v305_v7 = vpop.f32.mrb[0].mxu0  ;;  %v366_v8 = vpop.f32.mrb[0].mxu1 }
 0x182   :  { %v367_v9 = vadd.f32 %v366_v8, %v139_v6  ;;  %v307_v10 = vpop.f32.mrb[1].mxu0  ;;  %v1250_v11 = vpop.f32.mrb[1].mxu1  ;;  %v306_v39 = vadd.f32 %v305_v7, %v1796_v35 }
 0x183   :  { %v1776_v12 = vpop.f32.mrb[2].mxu0  ;;  %v369_v13 = vpop.f32.mrb[2].mxu1  ;;  %v308_v41 = vadd.f32 %v307_v10, %v1798_v36  ;;  %v1805_v10 = vld [vmem:[%s1974_s4] ss:$0 sm:$0xff] }
 0x184   :  { %v1778_v14 = vadd.f32 %v369_v13, %v139_v6  ;;  %v1780_v15 = vpop.f32.mrb[3].mxu0  ;;  %v1251_v16 = vpop.f32.mrb[3].mxu1 }
 0x189   :  { %v1782_v17 = vpop.f32.mrb[4].mxu0  ;;  %v374_v18 = vpop.f32.mrb[4].mxu1 }
 0x18a   :  { %v1784_v19 = vadd.f32 %v374_v18, %v139_v6  ;;  %v1786_v20 = vpop.f32.mrb[5].mxu0  ;;  %v1254_v21 = vpop.f32.mrb[5].mxu1 }
 0x18b   :  { %v1788_v22 = vpop.f32.mrb[6].mxu0  ;;  %v377_v23 = vpop.f32.mrb[6].mxu1 }
 0x18c   :  { %v1790_v24 = vadd.f32 %v377_v23, %v139_v6  ;;  %v1792_v25 = vpop.f32.mrb[7].mxu0  ;;  %v1255_v26 = vpop.f32.mrb[7].mxu1 }
 0x191   :  { %v382_v27 = vpop.f32.mrb[8].mxu1 }
 0x192   :  { %v1794_v28 = vadd.f32 %v382_v27, %v139_v6  ;;  %v1258_v29 = vpop.f32.mrb[9].mxu1 }
 0x193   :  { %v385_v30 = vpop.f32.mrb[10].mxu1 }
 0x194   :  { %v1259_v32 = vpop.f32.mrb[11].mxu1 }
 0x1a1   :  { %v591_v48 = vpop.f32.mrb[12].mxu0 }
 0x1a2   :  { %v638_v63 = vadd.f32 %v591_v48, %v306_v39  ;;  %v593_v4 = vpop.f32.mrb[13].mxu0 }
 0x1a3   :  { %v645_v8 = vadd.f32 %v593_v4, %v308_v41  ;;  %v595_v11 = vpop.f32.mrb[14].mxu0 }
 0x1a4   :  { %v1162_v6 = vmul.f32 -1.442695, %v638_v63  ;;  %v596_v13 = vpop.f32.mrb[15].mxu0 }
 0x1a5   :  { %v1163_v3 = vmul.f32 -1.442695, %v645_v8 }
 0x1a6   :  { %1440 = vpow2.f32 %v1162_v6  ;;  %v632_v16 = vpop.f32.mrb[12].mxu1 }
 0x1a7   :  { %v1278_v18 = vpop.f32.mrb[13].mxu1  ;;  %1442 = vpow2.f32 %v1163_v3  ;;  %v652_v29 = vadd.f32 %v1805_v10, %v632_v16 }
 0x1a8   :  { %v635_v21 = vpop.f32.mrb[14].mxu1 }
 0x1a9   :  { %v1279_v23 = vpop.f32.mrb[15].mxu1 }
 0x1b0   :  { %v1441_v5 = vpop.eup %1440 }
 0x1b1   :  { %v642_v26 = vadd.f32 1.0, %v1441_v5  ;;  %v1443_v7 = vpop.eup %1442 }
 0x1b2   :  { %v649_v27 = vadd.f32 1.0, %v1443_v7 }
 0x1b3   :  { %1444 = vrcp.f32 %v642_v26 }
 0x1b4   :  { %1446 = vrcp.f32 %v649_v27 }
 0x1bd   :  { %v1445_v30 = vpop.eup %1444 }
 0x1be   :  { %v653_v32 = vmul.f32 %v1445_v30, %v652_v29  ;;  %v1447_v34 = vpop.eup %1446 }
 0x1bf   :  { %v656_v39 = vsub.f32 1.0, %v1447_v34  ;;  %v658_v63 = vmul.f32 %v1447_v34, %v1720_v61  ;;  %v310_v61 = vadd.f32 %v1776_v12, %v1796_v35 }
 0x1c0   :  { %v654_v33 = vadd.f32 %v653_v32, %v367_v9  ;;  %v312_v9 = vadd.f32 %v1780_v15, %v1798_v36 }
 0x1c2   :  { %1448 = vtanh.f32 %v654_v33 }
 0x1cc   :  { %v1449_v41 = vpop.eup %1448 }
 0x1cd   :  { %v657_v48 = vmul.f32 %v1449_v41, %v656_v39 }
 0x1cf   :  { %v1809_v4 = vadd.f32 %v658_v63, %v657_v48 }
 0x1d1   :  { %660 = vst [vmem:[%s1976_s6] sm:$0xff] %v1809_v4  ;;  %v661_v8 = vpack.c.bf16 %v1809_v4, %v1809_v4 }
 0x1d3   :  { %695 = vmatmul.mubr.bf16.vlgmr.msra.gmra.mrb[16].mxu0 %v661_v8  ;;  %1297 = vmatmul.mubr.bf16.vlgmr.msra.gmra.mrb[16].mxu1 %v661_v8 }
 0x1d4   :  { %769 = vmatpush1.bf16.msra.mxu0 %v1643_v37  ;;  %1301 = vmatpush3.bf16.msra.mxu1 %v1647_v40 }
 0x1d5   :  { %770 = vmatprep.subr.bf16.mxu0 %v1645_v38  ;;  %1302 = vmatprep.subr.bf16.mxu1 %v1543_v1 }
 0x1d6   :  { %800 = vmatprep.mubr.bf16.mxu0 %v1542_v0  ;;  %1316 = vmatprep.mubr.msk.bf16.mxu1 %vm1544_vm0, %v1543_v1 }
 0x1d8   :  { %771 = vmatpush1.bf16.msra.mxu0 %v1650_v42  ;;  %1303 = vmatpush3.bf16.msra.mxu1 %v1659_v44 }
 0x1d9   :  { %772 = vmatprep.subr.bf16.mxu0 %v1656_v43  ;;  %1304 = vmatprep.subr.bf16.mxu1 %v1543_v1 }
 0x1dc   :  { %773 = vmatpush1.bf16.msra.mxu0 %v1663_v45  ;;  %1305 = vmatpush3.bf16.msra.mxu1 %v1669_v47 }
 0x1dd   :  { %774 = vmatprep.subr.bf16.mxu0 %v1666_v46  ;;  %1306 = vmatprep.subr.bf16.mxu1 %v1543_v1 }
 0x1e0   :  { %775 = vmatpush1.bf16.msra.mxu0 %v1672_v49  ;;  %1307 = vmatpush3.bf16.msra.mxu1 %v1689_v53 }
 0x1e1   :  { %776 = vmatprep.subr.bf16.mxu0 %v1678_v50  ;;  %1308 = vmatprep.subr.bf16.mxu1 %v1543_v1 }
 0x1e4   :  { %777 = vmatpush1.bf16.msra.mxu0 %v1683_v51  ;;  %1309 = vmatpush3.bf16.msra.mxu1 %v1699_v56 }
 0x1e5   :  { %778 = vmatprep.subr.bf16.mxu0 %v1687_v52  ;;  %1310 = vmatprep.subr.bf16.mxu1 %v1543_v1 }
 0x1e8   :  { %779 = vmatpush1.bf16.msra.mxu0 %v1692_v54  ;;  %1311 = vmatpush3.bf16.msra.mxu1 %v1711_v59 }
 0x1e9   :  { %780 = vmatprep.subr.bf16.mxu0 %v1696_v55  ;;  %1312 = vmatprep.subr.bf16.mxu1 %v1543_v1 }
 0x1ec   :  { %781 = vmatpush1.bf16.msra.mxu0 %v1705_v57  ;;  %1313 = vmatpush3.bf16.msra.mxu1 %v1724_v62 }
 0x1ed   :  { %782 = vmatprep.subr.bf16.mxu0 %v1708_v58  ;;  %1314 = vmatprep.subr.bf16.mxu1 %v1543_v1 }
 0x1f0   :  { %783 = vmatpush1.bf16.msra.mxu0 %v1715_v60  ;;  %1315 = vmatpush3.bf16.msra.mxu1 %v1731_v2 }
 0x1f1   :  { %874 = vmatprep.subr.bf16.mxu0 %v1637_v31  ;;  %1320 = vmatprep.subr.bf16.mxu1 %v1543_v1 }
 0x2a6   :  { %v696_v11 = vpop.f32.mrb[16].mxu0  ;;  %v737_v6 = vpop.f32.mrb[16].mxu1 }
 0x2a7   :  { %v743_v13 = vadd.f32 %v696_v11, %v310_v61  ;;  %v698_v16 = vpop.f32.mrb[17].mxu0  ;;  %v1298_v18 = vpop.f32.mrb[17].mxu1  ;;  %v757_v15 = vadd.f32 %v1805_v10, %v737_v6 }
 0x2a8   :  { %v750_v21 = vadd.f32 %v698_v16, %v312_v9  ;;  %v700_v3 = vpop.f32.mrb[18].mxu0  ;;  %v740_v23 = vpop.f32.mrb[18].mxu1 }
 0x2a9   :  { %v1164_v5 = vmul.f32 -1.442695, %v743_v13  ;;  %v701_v26 = vpop.f32.mrb[19].mxu0  ;;  %v1299_v7 = vpop.f32.mrb[19].mxu1 }
 0x2aa   :  { %v1165_v27 = vmul.f32 -1.442695, %v750_v21 }
 0x2ab   :  { %1450 = vpow2.f32 %v1164_v5 }
 0x2ac   :  { %1452 = vpow2.f32 %v1165_v27 }
 0x2b5   :  { %v1451_v29 = vpop.eup %1450 }
 0x2b6   :  { %v747_v30 = vadd.f32 1.0, %v1451_v29  ;;  %v1453_v12 = vpop.eup %1452 }
 0x2b7   :  { %v754_v32 = vadd.f32 1.0, %v1453_v12 }
 0x2b8   :  { %1454 = vrcp.f32 %v747_v30 }
 0x2b9   :  { %1456 = vrcp.f32 %v754_v32 }
 0x2c2   :  { %v1455_v33 = vpop.eup %1454 }
 0x2c3   :  { %v758_v34 = vmul.f32 %v1455_v33, %v757_v15  ;;  %v1457_v41 = vpop.eup %1456 }
 0x2c4   :  { %v761_v48 = vsub.f32 1.0, %v1457_v41  ;;  %v763_v61 = vmul.f32 %v1457_v41, %v1809_v4  ;;  %v318_v4 = vadd.f32 %v1786_v20, %v1798_v36 }
 0x2c5   :  { %v759_v39 = vadd.f32 %v758_v34, %v1778_v14  ;;  %v316_v14 = vadd.f32 %v1782_v17, %v1796_v35 }
 0x2c7   :  { %1458 = vtanh.f32 %v759_v39 }
 0x2d1   :  { %v1459_v63 = vpop.eup %1458 }
 0x2d2   :  { %v762_v8 = vmul.f32 %v1459_v63, %v761_v48 }
 0x2d4   :  { %v1859_v9 = vadd.f32 %v763_v61, %v762_v8 }
 0x2d6   :  { %1166 = vst [vmem:[%s1976_s6 + $0x8] sm:$0xff] %v1859_v9  ;;  %v767_v11 = vpack.c.bf16 %v1859_v9, %v1859_v9 }
 0x2d8   :  { %801 = vmatmul.mubr.bf16.vlgmr.msra.gmra.mrb[20].mxu0 %v767_v11  ;;  %1317 = vmatmul.mubr.bf16.vlgmr.msra.gmra.mrb[20].mxu1 %v767_v11 }
 0x2d9   :  { %875 = vmatpush1.bf16.msra.mxu0 %v1643_v37  ;;  %1321 = vmatpush3.bf16.msra.mxu1 %v1647_v40 }
 0x2da   :  { %876 = vmatprep.subr.bf16.mxu0 %v1645_v38  ;;  %1322 = vmatprep.subr.bf16.mxu1 %v1543_v1 }
 0x2db   :  { %906 = vmatprep.mubr.bf16.mxu0 %v1542_v0  ;;  %1336 = vmatprep.mubr.msk.bf16.mxu1 %vm1544_vm0, %v1543_v1 }
 0x2dd   :  { %877 = vmatpush1.bf16.msra.mxu0 %v1650_v42  ;;  %1323 = vmatpush3.bf16.msra.mxu1 %v1659_v44 }
 0x2de   :  { %878 = vmatprep.subr.bf16.mxu0 %v1656_v43  ;;  %1324 = vmatprep.subr.bf16.mxu1 %v1543_v1 }
 0x2e1   :  { %879 = vmatpush1.bf16.msra.mxu0 %v1663_v45  ;;  %1325 = vmatpush3.bf16.msra.mxu1 %v1669_v47 }
 0x2e2   :  { %880 = vmatprep.subr.bf16.mxu0 %v1666_v46  ;;  %1326 = vmatprep.subr.bf16.mxu1 %v1543_v1 }
 0x2e5   :  { %881 = vmatpush1.bf16.msra.mxu0 %v1672_v49  ;;  %1327 = vmatpush3.bf16.msra.mxu1 %v1689_v53 }
 0x2e6   :  { %882 = vmatprep.subr.bf16.mxu0 %v1678_v50  ;;  %1328 = vmatprep.subr.bf16.mxu1 %v1543_v1 }
 0x2e9   :  { %883 = vmatpush1.bf16.msra.mxu0 %v1683_v51  ;;  %1329 = vmatpush3.bf16.msra.mxu1 %v1699_v56 }
 0x2ea   :  { %884 = vmatprep.subr.bf16.mxu0 %v1687_v52  ;;  %1330 = vmatprep.subr.bf16.mxu1 %v1543_v1 }
 0x2ed   :  { %885 = vmatpush1.bf16.msra.mxu0 %v1692_v54  ;;  %1331 = vmatpush3.bf16.msra.mxu1 %v1711_v59 }
 0x2ee   :  { %886 = vmatprep.subr.bf16.mxu0 %v1696_v55  ;;  %1332 = vmatprep.subr.bf16.mxu1 %v1543_v1 }
 0x2f1   :  { %887 = vmatpush1.bf16.msra.mxu0 %v1705_v57  ;;  %1333 = vmatpush3.bf16.msra.mxu1 %v1724_v62 }
 0x2f2   :  { %888 = vmatprep.subr.bf16.mxu0 %v1708_v58  ;;  %1334 = vmatprep.subr.bf16.mxu1 %v1543_v1 }
 0x2f5   :  { %889 = vmatpush1.bf16.msra.mxu0 %v1715_v60  ;;  %1335 = vmatpush3.bf16.msra.mxu1 %v1731_v2 }
 0x2f6   :  { %980 = vmatprep.subr.bf16.mxu0 %v1637_v31  ;;  %1340 = vmatprep.subr.bf16.mxu1 %v1543_v1 }
 0x3ab   :  { %v802_v6 = vpop.f32.mrb[20].mxu0  ;;  %v843_v13 = vpop.f32.mrb[20].mxu1 }
 0x3ac   :  { %v849_v16 = vadd.f32 %v802_v6, %v316_v14  ;;  %v804_v18 = vpop.f32.mrb[21].mxu0  ;;  %v1318_v21 = vpop.f32.mrb[21].mxu1  ;;  %v863_v20 = vadd.f32 %v1805_v10, %v843_v13 }
 0x3ad   :  { %v856_v3 = vadd.f32 %v804_v18, %v318_v4  ;;  %v806_v23 = vpop.f32.mrb[22].mxu0  ;;  %v846_v5 = vpop.f32.mrb[22].mxu1 }
 0x3ae   :  { %v1167_v26 = vmul.f32 -1.442695, %v849_v16  ;;  %v807_v7 = vpop.f32.mrb[23].mxu0  ;;  %v1319_v27 = vpop.f32.mrb[23].mxu1 }
 0x3af   :  { %v1168_v31 = vmul.f32 -1.442695, %v856_v3 }
 0x3b0   :  { %1460 = vpow2.f32 %v1167_v26 }
 0x3b1   :  { %1462 = vpow2.f32 %v1168_v31 }
 0x3ba   :  { %v1461_v29 = vpop.eup %1460 }
 0x3bb   :  { %v853_v30 = vadd.f32 1.0, %v1461_v29  ;;  %v1463_v17 = vpop.eup %1462 }
 0x3bc   :  { %v860_v12 = vadd.f32 1.0, %v1463_v17 }
 0x3bd   :  { %1464 = vrcp.f32 %v853_v30 }
 0x3be   :  { %1466 = vrcp.f32 %v860_v12 }
 0x3c7   :  { %v1465_v32 = vpop.eup %1464 }
 0x3c8   :  { %v864_v15 = vmul.f32 %v1465_v32, %v863_v20  ;;  %v1467_v34 = vpop.eup %1466 }
 0x3c9   :  { %v867_v39 = vsub.f32 1.0, %v1467_v34  ;;  %v869_v63 = vmul.f32 %v1467_v34, %v1859_v9 }
 0x3ca   :  { %v865_v33 = vadd.f32 %v864_v15, %v1784_v19 }
 0x3cc   :  { %1468 = vtanh.f32 %v865_v33 }
 0x3d6   :  { %v1469_v41 = vpop.eup %1468 }
 0x3d7   :  { %v868_v48 = vmul.f32 %v1469_v41, %v867_v39 }
 0x3d9   :  { %v1909_v8 = vadd.f32 %v869_v63, %v868_v48 }
 0x3db   :  { %1169 = vst [vmem:[%s1976_s6 + $0x10] sm:$0xff] %v1909_v8  ;;  %v873_v61 = vpack.c.bf16 %v1909_v8, %v1909_v8 }
 0x3dd   :  { %907 = vmatmul.mubr.bf16.vlgmr.msra.gmra.mrb[24].mxu0 %v873_v61  ;;  %1337 = vmatmul.mubr.bf16.vlgmr.msra.gmra.mrb[24].mxu1 %v873_v61 }
 0x3de   :  { %981 = vmatpush1.bf16.msra.mxu0 %v1643_v37  ;;  %1341 = vmatpush3.bf16.msra.mxu1 %v1647_v40  ;;  %v322_v37 = vadd.f32 %v1792_v25, %v1798_v36 }
 0x3df   :  { %982 = vmatprep.subr.bf16.mxu0 %v1645_v38  ;;  %1342 = vmatprep.subr.bf16.mxu1 %v1543_v1 }
 0x3e0   :  { %1012 = vmatprep.mubr.bf16.mxu0 %v1542_v0  ;;  %1356 = vmatprep.mubr.msk.bf16.mxu1 %vm1544_vm0, %v1543_v1  ;;  %v320_v0 = vadd.f32 %v1788_v22, %v1796_v35 }
 0x3e2   :  { %983 = vmatpush1.bf16.msra.mxu0 %v1650_v42  ;;  %1343 = vmatpush3.bf16.msra.mxu1 %v1659_v44 }
 0x3e3   :  { %984 = vmatprep.subr.bf16.mxu0 %v1656_v43  ;;  %1344 = vmatprep.subr.bf16.mxu1 %v1543_v1 }
 0x3e6   :  { %985 = vmatpush1.bf16.msra.mxu0 %v1663_v45  ;;  %1345 = vmatpush3.bf16.msra.mxu1 %v1669_v47 }
 0x3e7   :  { %986 = vmatprep.subr.bf16.mxu0 %v1666_v46  ;;  %1346 = vmatprep.subr.bf16.mxu1 %v1543_v1 }
 0x3ea   :  { %987 = vmatpush1.bf16.msra.mxu0 %v1672_v49  ;;  %1347 = vmatpush3.bf16.msra.mxu1 %v1689_v53 }
 0x3eb   :  { %988 = vmatprep.subr.bf16.mxu0 %v1678_v50  ;;  %1348 = vmatprep.subr.bf16.mxu1 %v1543_v1 }
 0x3ee   :  { %989 = vmatpush1.bf16.msra.mxu0 %v1683_v51  ;;  %1349 = vmatpush3.bf16.msra.mxu1 %v1699_v56 }
 0x3ef   :  { %990 = vmatprep.subr.bf16.mxu0 %v1687_v52  ;;  %1350 = vmatprep.subr.bf16.mxu1 %v1543_v1 }
 0x3f2   :  { %991 = vmatpush1.bf16.msra.mxu0 %v1692_v54  ;;  %1351 = vmatpush3.bf16.msra.mxu1 %v1711_v59 }
 0x3f3   :  { %992 = vmatprep.subr.bf16.mxu0 %v1696_v55  ;;  %1352 = vmatprep.subr.bf16.mxu1 %v1543_v1 }
 0x3f6   :  { %993 = vmatpush1.bf16.msra.mxu0 %v1705_v57  ;;  %1353 = vmatpush3.bf16.msra.mxu1 %v1724_v62 }
 0x3f7   :  { %994 = vmatprep.subr.bf16.mxu0 %v1708_v58  ;;  %1354 = vmatprep.subr.bf16.mxu1 %v1543_v1 }
 0x3fa   :  { %995 = vmatpush1.bf16.msra.mxu0 %v1715_v60  ;;  %1355 = vmatpush3.bf16.msra.mxu1 %v1731_v2 }
 0x4b0   :  { %v908_v38 = vpop.f32.mrb[24].mxu0  ;;  %v949_v40 = vpop.f32.mrb[24].mxu1 }
 0x4b1   :  { %v955_v42 = vadd.f32 %v908_v38, %v320_v0  ;;  %v910_v43 = vpop.f32.mrb[25].mxu0  ;;  %v1338_v44 = vpop.f32.mrb[25].mxu1  ;;  %v969_v56 = vadd.f32 %v1805_v10, %v949_v40 }
 0x4b2   :  { %v962_v45 = vadd.f32 %v910_v43, %v322_v37  ;;  %v912_v46 = vpop.f32.mrb[26].mxu0  ;;  %v952_v47 = vpop.f32.mrb[26].mxu1 }
 0x4b3   :  { %v1170_v49 = vmul.f32 -1.442695, %v955_v42  ;;  %v913_v1 = vpop.f32.mrb[27].mxu0  ;;  %v1339_v50 = vpop.f32.mrb[27].mxu1 }
 0x4b4   :  { %v1171_v51 = vmul.f32 -1.442695, %v962_v45 }
 0x4b5   :  { %1470 = vpow2.f32 %v1170_v49 }
 0x4b6   :  { %1472 = vpow2.f32 %v1171_v51 }
 0x4bf   :  { %v1471_v52 = vpop.eup %1470 }
 0x4c0   :  { %v959_v53 = vadd.f32 1.0, %v1471_v52  ;;  %v1473_v54 = vpop.eup %1472 }
 0x4c1   :  { %v966_v55 = vadd.f32 1.0, %v1473_v54 }
 0x4c2   :  { %1474 = vrcp.f32 %v959_v53 }
 0x4c3   :  { %1476 = vrcp.f32 %v966_v55 }
 0x4cc   :  { %v1475_v57 = vpop.eup %1474 }
 0x4cd   :  { %v970_v58 = vmul.f32 %v1475_v57, %v969_v56  ;;  %v1477_v60 = vpop.eup %1476 }
 0x4ce   :  { %v973_v62 = vsub.f32 1.0, %v1477_v60  ;;  %v975_v22 = vmul.f32 %v1477_v60, %v1909_v8 }
 0x4cf   :  { %v971_v59 = vadd.f32 %v970_v58, %v1790_v24 }
 0x4d1   :  { %1478 = vtanh.f32 %v971_v59 }
 0x4db   :  { %v1479_v2 = vpop.eup %1478 }
 0x4dc   :  { %v974_v19 = vmul.f32 %v1479_v2, %v973_v62 }
 0x4de   :  { %v976_v25 = vadd.f32 %v975_v22, %v974_v19 }
 0x4e0   :  { %1172 = vst [vmem:[%s1976_s6 + $0x18] sm:$0xff] %v976_v25  ;;  %v979_v9 = vpack.c.bf16 %v976_v25, %v976_v25 }
 0x4e2   :  { %1013 = vmatmul.mubr.bf16.vlgmr.msra.gmra.mrb[8].mxu0 %v979_v9  ;;  %1357 = vmatmul.mubr.bf16.vlgmr.msra.gmra.mrb[28].mxu1 %v979_v9 }
 0x5b5   :  { %v1014_v11 = vpop.f32.mrb[8].mxu0  ;;  %v1055_v14 = vpop.f32.mrb[28].mxu1 }
 0x5b6   :  { %v1360_v4 = vadd.f32 %v1014_v11, %v1796_v35  ;;  %v1016_v24 = vpop.f32.mrb[9].mxu0  ;;  %v1358_v6 = vpop.f32.mrb[29].mxu1  ;;  %v1075_v29 = vadd.f32 %v1805_v10, %v1055_v14 }
 0x5b7   :  { %v1018_v13 = vpop.f32.mrb[10].mxu0  ;;  %v1058_v16 = vpop.f32.mrb[30].mxu1  ;;  %v1361_v23 = vadd.f32 %v1016_v24, %v1798_v36 }
 0x5b8   :  { %v1173_v18 = vmul.f32 -1.442695, %v1360_v4  ;;  %v1019_v21 = vpop.f32.mrb[11].mxu0  ;;  %v1359_v3 = vpop.f32.mrb[31].mxu1 }
 0x5b9   :  { %v1174_v5 = vmul.f32 -1.442695, %v1361_v23 }
 0x5ba   :  { %1480 = vpow2.f32 %v1173_v18 }
 0x5bb   :  { %1482 = vpow2.f32 %v1174_v5 }
 0x5c4   :  { %v1481_v26 = vpop.eup %1480 }
 0x5c5   :  { %v1065_v7 = vadd.f32 1.0, %v1481_v26  ;;  %v1483_v27 = vpop.eup %1482 }
 0x5c6   :  { %v1072_v31 = vadd.f32 1.0, %v1483_v27 }
 0x5c7   :  { %1484 = vrcp.f32 %v1065_v7 }
 0x5c8   :  { %1486 = vrcp.f32 %v1072_v31 }
 0x5d1   :  { %v1485_v35 = vpop.eup %1484 }
 0x5d2   :  { %v1076_v30 = vmul.f32 %v1485_v35, %v1075_v29  ;;  %v1487_v12 = vpop.eup %1486 }
 0x5d3   :  { %v1079_v20 = vsub.f32 1.0, %v1487_v12  ;;  %v1081_v15 = vmul.f32 %v1487_v12, %v976_v25 }
 0x5d4   :  { %v1077_v17 = vadd.f32 %v1076_v30, %v1794_v28 }
 0x5d6   :  { %1488 = vtanh.f32 %v1077_v17 }
 0x5e0   :  { %v1489_v32 = vpop.eup %1488 }
 0x5e1   :  { %v1080_v36 = vmul.f32 %v1489_v32, %v1079_v20 }
 0x5e3   :  { %v1082_v33 = vadd.f32 %v1081_v15, %v1080_v36 }
 0x5e5   :  { %1175 = vst [vmem:[%s1976_s6 + $0x20] sm:$0xff] %v1082_v33  ;;  %1085 = vst [vmem:[%s1977_s7] sm:$0xff] %v1082_v33 }
 0x5e6   :  { %1094 = vsyncpa [#allocation3], 1 }
 0x5e7   :  { %1095 = vsyncpa [#allocation5], 1 }

</bundles_post_ra>
